<compile_context>
chip_gen: v6e
topology: v6e:2x2x1
jax: 0.10.0
libtpu: 0.0.40
codegen_flags: <defaults>
</compile_context>

<pallas_src>
import functools

import jax
import jax.numpy as jnp
from jax import lax
from jax.experimental import pallas as pl
from jax.experimental.pallas import tpu as pltpu


def _round_up(x, m):
    return ((x + m - 1) // m) * m


def _quantile_loss_kernel(preds_ref, target_ref, qv_ref,
                          psum_out_ref, vsum_out_ref,
                          psum_ref, vsum_ref,
                          *, n_total, tile_n, tiles_per_split):
    c = pl.program_id(0)          # split index ("parallel" axis)
    k = pl.program_id(1)          # tile-within-split index ("arbitrary" axis)

    @pl.when(k == 0)
    def _init():
        psum_ref[...] = jnp.zeros_like(psum_ref)
        vsum_ref[...] = jnp.zeros_like(vsum_ref)

    preds = preds_ref[...]        # (Q, T)  quantiles on sublanes, batch on lanes
    target = target_ref[...]      # (1, T) or (Q, T)
    qv = qv_ref[...]              # (Q, 1)
    q = preds.shape[0]            # static

    # Mask off padded lanes of the last (global) tile so means use the true N.
    tile_idx = c * tiles_per_split + k
    col = tile_idx * tile_n + lax.broadcasted_iota(jnp.int32, (1, tile_n), 1)
    valid = col < n_total         # (1, T)

    # pinball: where(e < 0, (q-1)*e, q*e)  ==  max((q-1)*e, q*e)
    errors = target - preds                        # (Q, T), sublane broadcast
    coef = jnp.where(errors < 0.0, qv - 1.0, qv)   # (Q, T), per-sublane qv broadcast
    pinball = jnp.where(valid, coef * errors, 0.0)
    psum_ref[...] += jnp.sum(pinball, keepdims=True)

    if q > 1:   # static at trace time, mirrors `if preds.size(1) > 1`
        # adjacent-quantile diff is a static sublane slice in this layout
        diff = preds[1:, :] - preds[:-1, :]        # (Q-1, T)
        viol = jnp.maximum(0.001 - diff, 0.0)
        vsq = jnp.where(valid, viol * viol, 0.0)
        vsum_ref[...] += jnp.sum(vsq, keepdims=True)

    @pl.when(k == pl.num_programs(1) - 1)
    def _finalize():
        # raw partial sums for this split, written as a lane-dense (8,128) slab
        psum_out_ref[...] = jnp.broadcast_to(psum_ref[...], (8, 128))
        vsum_out_ref[...] = jnp.broadcast_to(vsum_ref[...], (8, 128))


def quantile_loss(preds, target, quantiles, *, tile_n=65536):
    """Pinball loss + monotonicity penalty, matching QuantileLoss.forward.

    preds: (N, Q) float; target: (N,), (N, 1) or (N, Q); quantiles: length-Q seq.
    """
    preds = preds.astype(jnp.float32)
    n, q = preds.shape
    assert target.shape[0] == n

    # Lane-dense layout: batch N -> lanes, quantiles -> sublanes.
    # (Ideally the producer would already emit (Q, N); here it is wrapper plumbing.)
    preds_t = preds.T                                            # (Q, N)
    target = target.astype(jnp.float32)
    if target.ndim == 1:
        target = target[:, None]
    # (N,1) -> (1,N) is a pure reshape (no copy); full (N,Q) targets need a transpose.
    target_t = target.reshape(1, n) if target.shape[1] == 1 else target.T
    tq = target_t.shape[0]
    qv = jnp.asarray(quantiles, dtype=jnp.float32).reshape(q, 1)

    # Tile the batch axis (lanes want multiples of 128; big tiles amortize the
    # ~0.35us per-grid-step overhead while staying far under the VMEM budget).
    tile_n = max(128, _round_up(min(tile_n, _round_up(n, 128)), 128))
    num_tiles = pl.cdiv(n, tile_n)
    # Split tiles across TensorCores (2 on v7x) when the tile count divides
    # evenly, so no block window is ever fully out of bounds.
    num_splits = 2 if (num_tiles >= 2 and num_tiles % 2 == 0) else 1
    tiles_per_split = num_tiles // num_splits

    kernel = functools.partial(
        _quantile_loss_kernel,
        n_total=n, tile_n=tile_n, tiles_per_split=tiles_per_split)

    psum_slab, vsum_slab = pl.pallas_call(
        kernel,
        out_shape=(
            jax.ShapeDtypeStruct((num_splits * 8, 128), jnp.float32),
            jax.ShapeDtypeStruct((num_splits * 8, 128), jnp.float32),
        ),
        grid=(num_splits, tiles_per_split),
        in_specs=[
            pl.BlockSpec((q, tile_n), lambda c, k: (0, c * tiles_per_split + k)),
            pl.BlockSpec((tq, tile_n), lambda c, k: (0, c * tiles_per_split + k)),
            pl.BlockSpec((q, 1), lambda c, k: (0, 0)),
        ],
        out_specs=(
            pl.BlockSpec((8, 128), lambda c, k: (c, 0)),
            pl.BlockSpec((8, 128), lambda c, k: (c, 0)),
        ),
        scratch_shapes=[
            pltpu.VMEM((1, 1), jnp.float32),   # running pinball sum
            pltpu.VMEM((1, 1), jnp.float32),   # running penalty sum
        ],
        compiler_params=pltpu.CompilerParams(
            dimension_semantics=("parallel", "arbitrary"),
            vmem_limit_bytes=32 * 1024 * 1024,
        ),
        cost_estimate=pl.CostEstimate(
            flops=10 * n * q,
            transcendentals=0,
            bytes_accessed=4 * (n * q + n * tq + q) + 2 * num_splits * 8 * 128 * 4,
        ),
    )(preds_t, target_t, qv)

    # Tiny cross-split reduction + single final division in the wrapper.
    psum = jnp.sum(psum_slab[::8, 0])          # one row per split
    loss = psum / (n * q)
    if q > 1:
        vsum = jnp.sum(vsum_slab[::8, 0])
        loss = loss + 100.0 * vsum / (n * (q - 1))
    return loss


def _quantile_loss_ref(preds, target, quantiles):
    """Plain-JAX reference mirroring the PyTorch forward."""
    preds = preds.astype(jnp.float32)
    qv = jnp.asarray(quantiles, dtype=jnp.float32)[None, :]
    qv_1 = qv - 1.0
    errors = target.astype(jnp.float32) - preds
    losses = jnp.maximum(qv_1 * errors, qv * errors).mean(axis=0)
    loss = losses.mean()
    if preds.shape[1] > 1:
        diff = preds[:, 1:] - preds[:, :-1]
        penalty = 100.0 * jnp.square(
            jnp.maximum(jnp.zeros_like(diff), 0.001 - diff)
        ).mean(axis=0).mean()
        loss = loss + penalty
    return loss


if __name__ == "__main__":
    quantiles = (0.1, 0.5, 0.9)        # Q = 3, the module's "parameter"
    N, Q = 700, len(quantiles)         # small batch; 700 = 5*128 + 60 -> remainder tile

    key = jax.random.PRNGKey(0)
    k_preds, k_target = jax.random.split(key)
    preds = jax.random.normal(k_preds, (N, Q), dtype=jnp.float32)
    target = jax.random.normal(k_target, (N, 1), dtype=jnp.float32)   # broadcasts vs (N, Q)

    ref = _quantile_loss_ref(preds, target, quantiles)

    # Small tiles: exercises the 2-way split, multi-step accumulation and the
    # masked remainder tile (6 tiles of 128 -> 2 splits x 3 tiles each).
    loss_small = quantile_loss(preds, target, quantiles, tile_n=128)
    jax.block_until_ready(loss_small)
    assert jnp.allclose(loss_small, ref, rtol=1e-5, atol=1e-5), (loss_small, ref)

    # Default (large) tiles: single padded tile, single split.
    loss_big = quantile_loss(preds, target, quantiles)
    jax.block_until_ready(loss_big)
    assert jnp.allclose(loss_big, ref, rtol=1e-5, atol=1e-5), (loss_big, ref)

    print("KERNEL_OK")
</pallas_src>

<mosaic_0001>
module attributes {stable_mosaic.version = 11 : i64} {
  func.func @_quantile_loss_kernel(%arg0: i32, %arg1: i32, %arg2: memref<3x128xf32, #tpu.memory_space<vmem>>, %arg3: memref<1x128xf32, #tpu.memory_space<vmem>>, %arg4: memref<3x1xf32, #tpu.memory_space<vmem>>, %arg5: memref<8x128xf32, #tpu.memory_space<vmem>>, %arg6: memref<8x128xf32, #tpu.memory_space<vmem>>, %arg7: memref<1x1xf32, #tpu.memory_space<vmem>>, %arg8: memref<1x1xf32, #tpu.memory_space<vmem>>) attributes {dimension_semantics = [#tpu.dimension_semantics<parallel>, #tpu.dimension_semantics<arbitrary>], iteration_bounds = array<i64: 2, 3>, scalar_prefetch = 0 : i64, scratch_operands = 2 : i64, tpu.core_type = #tpu.core_type<tc>, window_params = [{transform_indices = @transform_0, window_bounds = array<i64: 3, 128>}, {transform_indices = @transform_1, window_bounds = array<i64: 1, 128>}, {pipeline_mode = #tpu.pipeline_mode<synchronous>, transform_indices = @transform_2, window_bounds = array<i64: 3, 1>}, {transform_indices = @transform_3, window_bounds = array<i64: 8, 128>}, {transform_indices = @transform_4, window_bounds = array<i64: 8, 128>}]} {
    %c0_i32 = arith.constant 0 : i32
    %0 = arith.cmpi eq, %arg1, %c0_i32 : i32
    %1 = arith.extui %0 : i1 to i32
    %c0_i32_0 = arith.constant 0 : i32
    %2 = arith.cmpi ne, %1, %c0_i32_0 : i32
    scf.if %2 {
      %cst_22 = arith.constant 0.000000e+00 : f32
      %61 = vector.broadcast %cst_22 : f32 to vector<1x1xf32>
      %c0_23 = arith.constant 0 : index
      %c0_24 = arith.constant 0 : index
      %62 = vector.load %arg7[%c0_23, %c0_24] : memref<1x1xf32, #tpu.memory_space<vmem>>, vector<1x1xf32>
      tpu.vector_store %arg7[%c0_23, %c0_24], %61 {strides = array<i32>} : memref<1x1xf32, #tpu.memory_space<vmem>>, vector<1x1xf32>,
      %cst_25 = arith.constant 0.000000e+00 : f32
      %63 = vector.broadcast %cst_25 : f32 to vector<1x1xf32>
      %c0_26 = arith.constant 0 : index
      %c0_27 = arith.constant 0 : index
      %64 = vector.load %arg8[%c0_26, %c0_27] : memref<1x1xf32, #tpu.memory_space<vmem>>, vector<1x1xf32>
      tpu.vector_store %arg8[%c0_26, %c0_27], %63 {strides = array<i32>} : memref<1x1xf32, #tpu.memory_space<vmem>>, vector<1x1xf32>,
    } else {
    }
    %c0 = arith.constant 0 : index
    %c0_1 = arith.constant 0 : index
    %3 = vector.load %arg2[%c0, %c0_1] : memref<3x128xf32, #tpu.memory_space<vmem>>, vector<3x128xf32>
    %c0_2 = arith.constant 0 : index
    %c0_3 = arith.constant 0 : index
    %4 = vector.load %arg3[%c0_2, %c0_3] : memref<1x128xf32, #tpu.memory_space<vmem>>, vector<1x128xf32>
    %c0_4 = arith.constant 0 : index
    %c0_5 = arith.constant 0 : index
    %5 = vector.load %arg4[%c0_4, %c0_5] : memref<3x1xf32, #tpu.memory_space<vmem>>, vector<3x1xf32>
    %c3_i32 = arith.constant 3 : i32
    %6 = arith.muli %arg0, %c3_i32 : i32
    %7 = arith.addi %6, %arg1 : i32
    %c128_i32 = arith.constant 128 : i32
    %8 = arith.muli %7, %c128_i32 : i32
    %9 = tpu.iota {dimensions = array<i32: 1>} : vector<1x128xi32>
    %10 = vector.broadcast %8 : i32 to vector<1x128xi32>
    %11 = arith.addi %10, %9 : vector<1x128xi32>
    %c700_i32 = arith.constant 700 : i32
    %12 = vector.broadcast %c700_i32 : i32 to vector<1x128xi32>
    %13 = arith.cmpi slt, %11, %12 : vector<1x128xi32>
    %14 = vector.broadcast %4 : vector<1x128xf32> to vector<3x128xf32>
    %15 = arith.subf %14, %3 : vector<3x128xf32>
    %cst = arith.constant 0.000000e+00 : f32
    %16 = vector.broadcast %cst : f32 to vector<3x128xf32>
    %17 = arith.cmpf olt, %15, %16 : vector<3x128xf32>
    %cst_6 = arith.constant 1.000000e+00 : f32
    %18 = vector.broadcast %cst_6 : f32 to vector<3x1xf32>
    %19 = arith.subf %5, %18 : vector<3x1xf32>
    %20 = vector.shape_cast %19 : vector<3x1xf32> to vector<3x1xf32>
    %21 = vector.broadcast %20 : vector<3x1xf32> to vector<3x128xf32>
    %22 = vector.shape_cast %5 : vector<3x1xf32> to vector<3x1xf32>
    %23 = vector.broadcast %22 : vector<3x1xf32> to vector<3x128xf32>
    %24 = arith.select %17, %21, %23 : vector<3x128xi1>, vector<3x128xf32>
    %25 = arith.mulf %24, %15 : vector<3x128xf32>
    %cst_7 = arith.constant 0.000000e+00 : f32
    %26 = vector.shape_cast %13 : vector<1x128xi1> to vector<1x128xi1>
    %27 = vector.broadcast %26 : vector<1x128xi1> to vector<3x128xi1>
    %28 = vector.broadcast %cst_7 : f32 to vector<3x128xf32>
    %29 = arith.select %27, %25, %28 : vector<3x128xi1>, vector<3x128xf32>
    %c0_8 = arith.constant 0 : index
    %c0_9 = arith.constant 0 : index
    %30 = vector.load %arg7[%c0_8, %c0_9] : memref<1x1xf32, #tpu.memory_space<vmem>>, vector<1x1xf32>
    %31 = vector.shape_cast %29 : vector<3x128xf32> to vector<1x3x128xf32>
    %cst_10 = arith.constant dense<0.000000e+00> : vector<1xf32>
    %32 = vector.multi_reduction <add>, %31, %cst_10 [1, 2] : vector<1x3x128xf32> to vector<1xf32>
    %33 = vector.shape_cast %32 : vector<1xf32> to vector<1x1x1xf32>
    %34 = vector.extract %33[0, 0, 0] : f32 from vector<1x1x1xf32>
    %35 = vector.broadcast %34 : f32 to vector<1x1xf32>
    %36 = arith.addf %30, %35 : vector<1x1xf32>
    %c0_11 = arith.constant 0 : index
    %c0_12 = arith.constant 0 : index
    %37 = vector.load %arg7[%c0_11, %c0_12] : memref<1x1xf32, #tpu.memory_space<vmem>>, vector<1x1xf32>
    tpu.vector_store %arg7[%c0_11, %c0_12], %36 {strides = array<i32>} : memref<1x1xf32, #tpu.memory_space<vmem>>, vector<1x1xf32>,
    %38 = vector.extract_strided_slice %3 {offsets = [1, 0], sizes = [2, 128], strides = [1, 1]} : vector<3x128xf32> to vector<2x128xf32>
    %39 = vector.extract_strided_slice %3 {offsets = [0, 0], sizes = [2, 128], strides = [1, 1]} : vector<3x128xf32> to vector<2x128xf32>
    %40 = arith.subf %38, %39 : vector<2x128xf32>
    %cst_13 = arith.constant 1.000000e-03 : f32
    %41 = vector.broadcast %cst_13 : f32 to vector<2x128xf32>
    %42 = arith.subf %41, %40 : vector<2x128xf32>
    %cst_14 = arith.constant 0.000000e+00 : f32
    %43 = vector.broadcast %cst_14 : f32 to vector<2x128xf32>
    %44 = arith.maximumf %42, %43 : vector<2x128xf32>
    %45 = arith.mulf %44, %44 : vector<2x128xf32>
    %cst_15 = arith.constant 0.000000e+00 : f32
    %46 = vector.shape_cast %13 : vector<1x128xi1> to vector<1x128xi1>
    %47 = vector.broadcast %46 : vector<1x128xi1> to vector<2x128xi1>
    %48 = vector.broadcast %cst_15 : f32 to vector<2x128xf32>
    %49 = arith.select %47, %45, %48 : vector<2x128xi1>, vector<2x128xf32>
    %c0_16 = arith.constant 0 : index
    %c0_17 = arith.constant 0 : index
    %50 = vector.load %arg8[%c0_16, %c0_17] : memref<1x1xf32, #tpu.memory_space<vmem>>, vector<1x1xf32>
    %51 = vector.shape_cast %49 : vector<2x128xf32> to vector<1x2x128xf32>
    %cst_18 = arith.constant dense<0.000000e+00> : vector<1xf32>
    %52 = vector.multi_reduction <add>, %51, %cst_18 [1, 2] : vector<1x2x128xf32> to vector<1xf32>
    %53 = vector.shape_cast %52 : vector<1xf32> to vector<1x1x1xf32>
    %54 = vector.extract %53[0, 0, 0] : f32 from vector<1x1x1xf32>
    %55 = vector.broadcast %54 : f32 to vector<1x1xf32>
    %56 = arith.addf %50, %55 : vector<1x1xf32>
    %c0_19 = arith.constant 0 : index
    %c0_20 = arith.constant 0 : index
    %57 = vector.load %arg8[%c0_19, %c0_20] : memref<1x1xf32, #tpu.memory_space<vmem>>, vector<1x1xf32>
    tpu.vector_store %arg8[%c0_19, %c0_20], %56 {strides = array<i32>} : memref<1x1xf32, #tpu.memory_space<vmem>>, vector<1x1xf32>,
    %c2_i32 = arith.constant 2 : i32
    %58 = arith.cmpi eq, %arg1, %c2_i32 : i32
    %59 = arith.extui %58 : i1 to i32
    %c0_i32_21 = arith.constant 0 : i32
    %60 = arith.cmpi ne, %59, %c0_i32_21 : i32
    scf.if %60 {
      %c0_22 = arith.constant 0 : index
      %c0_23 = arith.constant 0 : index
      %61 = vector.load %arg7[%c0_22, %c0_23] : memref<1x1xf32, #tpu.memory_space<vmem>>, vector<1x1xf32>
      %62 = vector.shape_cast %61 : vector<1x1xf32> to vector<1x1xf32>
      %63 = vector.broadcast %62 : vector<1x1xf32> to vector<8x128xf32>
      %c0_24 = arith.constant 0 : index
      %c0_25 = arith.constant 0 : index
      %64 = vector.load %arg5[%c0_24, %c0_25] : memref<8x128xf32, #tpu.memory_space<vmem>>, vector<8x128xf32>
      tpu.vector_store %arg5[%c0_24, %c0_25], %63 {strides = array<i32>} : memref<8x128xf32, #tpu.memory_space<vmem>>, vector<8x128xf32>,
      %c0_26 = arith.constant 0 : index
      %c0_27 = arith.constant 0 : index
      %65 = vector.load %arg8[%c0_26, %c0_27] : memref<1x1xf32, #tpu.memory_space<vmem>>, vector<1x1xf32>
      %66 = vector.shape_cast %65 : vector<1x1xf32> to vector<1x1xf32>
      %67 = vector.broadcast %66 : vector<1x1xf32> to vector<8x128xf32>
      %c0_28 = arith.constant 0 : index
      %c0_29 = arith.constant 0 : index
      %68 = vector.load %arg6[%c0_28, %c0_29] : memref<8x128xf32, #tpu.memory_space<vmem>>, vector<8x128xf32>
      tpu.vector_store %arg6[%c0_28, %c0_29], %67 {strides = array<i32>} : memref<8x128xf32, #tpu.memory_space<vmem>>, vector<8x128xf32>,
    } else {
    }
    return
  }
  func.func @transform_0(%arg0: i32, %arg1: i32) -> (i32, i32) {
    %c3_i32 = arith.constant 3 : i32
    %0 = arith.muli %arg0, %c3_i32 : i32
    %1 = arith.addi %0, %arg1 : i32
    %c0_i32 = arith.constant 0 : i32
    %c0_i32_0 = arith.constant 0 : i32
    return %c0_i32, %1 : i32, i32
  }
  func.func @transform_1(%arg0: i32, %arg1: i32) -> (i32, i32) {
    %c3_i32 = arith.constant 3 : i32
    %0 = arith.muli %arg0, %c3_i32 : i32
    %1 = arith.addi %0, %arg1 : i32
    %c0_i32 = arith.constant 0 : i32
    %c0_i32_0 = arith.constant 0 : i32
    return %c0_i32, %1 : i32, i32
  }
  func.func @transform_2(%arg0: i32, %arg1: i32) -> (i32, i32) {
    %c0_i32 = arith.constant 0 : i32
    %c0_i32_0 = arith.constant 0 : i32
    %c0_i32_1 = arith.constant 0 : i32
    return %c0_i32, %c0_i32_0 : i32, i32
  }
  func.func @transform_3(%arg0: i32, %arg1: i32) -> (i32, i32) {
    %c0_i32 = arith.constant 0 : i32
    %c0_i32_0 = arith.constant 0 : i32
    return %arg0, %c0_i32 : i32, i32
  }
  func.func @transform_4(%arg0: i32, %arg1: i32) -> (i32, i32) {
    %c0_i32 = arith.constant 0 : i32
    %c0_i32_0 = arith.constant 0 : i32
    return %arg0, %c0_i32 : i32, i32
  }
}

</mosaic_0001>

<bundles_post_ra>
// kernel: tpu_custom_call.1
= control target key start
LH: loop header
LB: loop body
LE: loop exit
PB: predicated region body
PF: predicated region fallthrough
CT: control target
= control target key end

     0   :  { %10 = vsyncpa [#allocation5], 0  ;;  %s1112_s0 = inlined_call_operand.hbm [shape: f32[3,700], index: 0, kind: input, shape index: {}]   ;;  %s1113_s1 = inlined_call_operand.vmem [shape: f32[1,700], index: 1, kind: input, shape index: {}]   ;;  %s1114_s2 = inlined_call_operand.vmem [shape: f32[3,1], index: 2, kind: input, shape index: {}]   ;;  %s1115_s3 = inlined_call_operand.hbm [shape: f32[16,128], index: 3, kind: output, shape index: {0}]   ;;  %s1116_s4 = inlined_call_operand.hbm [shape: f32[16,128], index: 4, kind: output, shape index: {1}]  }
   0x1   :  { %12 = vsyncpa [#allocation5 + $0x1], 0 }
   0x2   :  { %13 = vsyncpa [#allocation6], 0 }
   0x3   :  { %15 = vsyncpa [#allocation6 + $0x1], 0 }
   0x4   :  { %16 = vsyncpa [#allocation9], 0 }
   0x5   :  { %18 = vsyncpa [#allocation9 + $0x1], 0  ;;  %s888_s15 = smov 0   ;;  %s890_s16 = smov 0  }
   0x6   :  { %s892_s17 = smov 0   ;;  %s894_s18 = smov 0  }
   0x7   :  { %s896_s19 = smov 0   ;;  %s898_s20 = smov 0  }
   0x8   :  { %s900_s21 = smov 0   ;;  %s902_s22 = smov 0  }
   0x9   :  { %s904_s23 = smov 0   ;;  %s906_s24 = smov 0  }
   0xa   :  { %s908_s25 = smov 0  }
   0xb LB: > { %1122 = sst [smem:[#allocation13_spill]] %s847_s23  ;;  %s538_s26 = sadd.s32 4294967295, %s855_s25   ;;  %s855_s25 = sphi %s908_s25, %s24_s25   ;;  %s851_s24 = sphi %s906_s24, %s1136_s24   ;;  %s847_s23 = sphi %s904_s23, %s1135_s23   ;;  %s843_s22 = sphi %s902_s22, %s1134_s22   ;;  %s839_s21 = sphi %s900_s21, %s1133_s21   ;;  %s835_s20 = sphi %s898_s20, %s1142_s20   ;;  %s831_s19 = sphi %s896_s19, %s1141_s19   ;;  %s827_s18 = sphi %s894_s18, %s1140_s18   ;;  %s823_s17 = sphi %s892_s17, %s1139_s17   ;;  %s819_s16 = sphi %s890_s16, %s1138_s16   ;;  %s815_s15 = sphi %s888_s15, %s1137_s15  }
   0xc   : > { %1123 = sst [smem:[#allocation14_spill]] %s851_s24  ;;  %s539_s27 = sadd.s32 4294967294, %s855_s25  }
   0xd   : > { %s33_s28 = sadd.s32 1, %s847_s23  ;;  %s36_s29 = sadd.s32 1, %s851_s24 }
   0xe   : > { %p34_p0 = scmp.ge.s32.totalorder %s33_s28, 3  ;;  %s40_s30 = smul.u32 3, %s851_s24 }
   0xf   : > { %s47_s5 = sadd.s32 1, %s835_s20  ;;  %p54_p1 = scmp.ne.s32.totalorder %s835_s20, %s831_s19 }
  0x10   : > { %s1144_s28 = smov (%p34_p0, %s33_s28), 0  ;;  %s1146_s29 = smov (!%p34_p0, %s36_s29), %s851_s24 }
  0x11   : > { %1124 = sst [smem:[#allocation15_spill]] %s1144_s28  ;;  %s41_s6 = sadd.s32 %s847_s23, %s40_s30 }
  0x12   : > { %p55_p2 = scmp.eq.s32.totalorder %s855_s25, 0  ;;  %p38_p3 = scmp.ge.s32.totalorder %s1146_s29, 2 }
  0x13   : > { %p60_p4 = scmp.ne.s32.totalorder %s831_s19, %s827_s18  ;;  %p61_p6 = scmp.eq.s32.totalorder %s538_s26, 0 }
  0x14   : > { %p955_p5 = por %p55_p2, %p54_p1  ;;  %s1148_s29 = smov (%p38_p3, %s1146_s29), 0 }
  0x15   : > { %1126 = sst [smem:[#allocation16_spill]] %s1148_s29  ;;  %p961_p7 = por %p61_p6, %p60_p4 }
  0x16   : > { %s124_s9 = sadd.s32 1, %s823_s17  ;;  %s42_s10 = smul.u32 3, %s1148_s29 }
  0x17   : > { %s121_s11 = ssub.s32 %s851_s24, %s1148_s29  ;;  %p134_p9 = scmp.ne.s32.totalorder %s823_s17, %s819_s16 }
  0x18   : > { %p122_p8 = scmp.eq.s32.totalorder %s121_s11, 0  ;;  %s43_s12 = sadd.s32 %s42_s10, %s1144_s28 }
  0x19   : > { %p135_p10 = scmp.eq.s32.totalorder %s538_s26, 5  ;;  %s44_s13 = ssub.s32 %s41_s6, %s43_s12 }
  0x1a   : > { %p140_p11 = scmp.ne.s32.totalorder %s819_s16, %s815_s15  ;;  %p45_p12 = scmp.eq.s32.totalorder %s44_s13, 0 }
  0x1b   : > { %p974_p13 = por %p135_p10, %p134_p9  ;;  %p141_p0 = scmp.eq.s32.totalorder %s539_s27, 5 }
  0x1c   : > { %s979_s18 = scalar_select %p122_p8, %s823_s17, %s124_s9  }
  0x1d   : > { %s982_s30 = scalar_select %p45_p12, %s835_s20, %s47_s5  }
  0x1e   : > { %p582_p1 = scmp.lt.s32.totalorder %s855_s25, 6  ;;  %s190_s11 = sand.u32 1, %s835_s20  }
  0x1f   : > { %p988_p2 = por %p141_p0, %p140_p11  ;;  %s542_s10 = sshll.u32 %s190_s11, 2 }
  0x20   : > { %s543_s12 = sshll.u32 %s41_s6, 6  ;;  %s194_s24 = scalar_lea.vmem [#allocation4], %s542_s10 }
  0x21   : > { %s1129_s26 = scalar_select %p988_p2, 1, 0 }
  0x22   : > { %s201_s28 = scalar_lea.hbm %s1112_s0, %s543_s12  ;;  %s203_s23 = sshll.u32 %s194_s24, 4  ;;  %s204_s23 = int_to_ptr.vmem [resolvable:$true] %s203_s23 }
  0x23   : > { %p997_p3 = pnand %p582_p1, %p955_p5  ;;  %p544_p4 = scmp.ge.s32.totalorder %s855_s25, 1 }
  0x24   : > { %p218_p6 = scmp.lt.s32.totalorder %s855_s25, 7  ;;  %s191_s27 = scalar_lea.sflag [#allocation5], %s190_s11 }
  0x25   : > { %p679_p8 = pneg %p997_p3  ;;  %s690_s9 = scalar_lea.vmem %s204_s23, 64 }
  0x26   : > { %p691_p9 = scmp.ne.s32.totalorder %s204_s23, %s690_s9  ;;  %s857_s29 = smov [#allocation4]  }
  0x27   : > { %s695_s6 = sshll.u32 %s857_s29, 4  ;;  %s696_s6 = int_to_ptr.vmem [resolvable:$false] %s695_s6 }
  0x28   : > { %p693_p10 = pnand %p691_p9, %p679_p8  ;;  %s697_s24 = scalar_lea.vmem %s696_s6, 128 }
  0x29   : > { %p698_p12 = scmp.lt.s32.totalorder %s204_s23, %s696_s6  ;;  %p699_p5 = scmp.lt.s32.totalorder %s697_s24, %s690_s9 }
  0x2a   : > { %p694_p11 = pneg %p693_p10 }
  0x2b   : > { %p700_p0 = por %p699_p5, %p698_p12 }
  0x2d   : > { %p701_p1 = pnand %p700_p0, %p694_p11 }
  0x2f   : > { %704 = shalt.err (!%p701_p1)
}
  0x30   : > { %574 = dma.hbm_to_vmem [thread:$0]  (!%p997_p3), %s201_s28, 64, %s204_s23, %s191_s27  }
  0x31   : > { %p219_p2 = pnand %p544_p4, %p218_p6 }
  0x32   : > { %s224_s7 = sand.u32 (!%p219_p2), 1, %s831_s19  }
  0x33   : > { %222 = sbr.rel (%p219_p2) target bundleno = 590 (0x24e), region = 32  ;;  %s545_s11 = sshll.u32 (!%p219_p2), %s224_s7, 2 }
  0x34   : > { %s225_s10 = scalar_lea.sflag (!%p219_p2), [#allocation5], %s224_s7  ;;  %s228_s12 = scalar_lea.vmem (!%p219_p2), [#allocation4], %s545_s11 }
  0x38   : > { %802 = dma.done.wait (%p961_p7), %s225_s10, 64  }
  0x39   : > { %804 = vsyncadd (%p961_p7), %s225_s10, 4294967232  ;;  %s1017_s13 = sand.u32 1, %s819_s16   ;;  %s265_s23 = smul.u32 3, %s843_s22 }
  0x3a   : > { %s546_s28 = sshll.u32 %s1017_s13, 3  ;;  %p548_p7 = scmp.ne.s32.totalorder %s839_s21, 0 }
  0x3b   : > { %s266_s5 = sadd.s32 %s839_s21, %s265_s23  ;;  %s1025_s24 = scalar_lea.vmem [#allocation7], %s546_s28 }
  0x3c   : > { %p267_p2 = scmp.lt.s32.totalorder %s266_s5, 5  ;;  %s1027_s7 = scalar_lea.vmem [#allocation8], %s546_s28 }
  0x3d   : > { %275 = sbr.rel (%p548_p7) target bundleno = 68 (0x44), region = 40 }
  0x3e   : > { %s268_s27 = scalar_select %p267_p2, %s266_s5, 5 }
  0x40   : > { %s269_s6 = scalar_lea.vmem %s1113_s1, %s268_s27 }
  0x42   : > { %vm276_vm0 = vcmask 0   ;;  %v858_v0 = vmov 0.0  }
  0x43   : > { %277 = vst.msk [vmem:[#allocation2] sm:$0x1] %vm276_vm0, %v858_v0  ;;  %278 = vst.msk [vmem:[#allocation3] sm:$0x1] %vm276_vm0, %v858_v0 }
  0x44 PF: > { %v281_v1 = vld [vmem:[%s1114_s2] sm:$0x7]  ;;  %v859_v2 = vmov 0   ;;  %v285_v7 = vlaneseq  ;;  %s549_s10 = sshll.u32 %s266_s5, 7  ;;  %vm315_vm3 = vcmask 1042432   ;;  %vm342_vm4 = vcmask 1041408  }
  0x45   : > { %675 = vset.pattern.permute.xlu0 %v859_v2  ;;  %v551_v3 = vadd.f32 -1.0, %v281_v1  ;;  %v279_v4 = vld [vmem:[%s228_s12] sm:$0x7]  ;;  %v550_v9 = vld [vmem:[%s269_s6] ss:$0 sm:$0xff]  ;;  %v287_v11 = vstv %s549_s10  ;;  %vm328_vm5 = vcmask 0  }
  0x46   : > { %v331_v5 = vrot.slane %v279_v4, 7  ;;  %v286_v10 = vand.u32 127, %v285_v7  ;;  %v296_v13 = vsub.f32 %v550_v9, %v279_v4  ;;  %p552_p3 = scmp.ne.s32.totalorder %s839_s21, 2 }
  0x47   : > { %301 = vperm.xlu0 %675, %v551_v3  }
  0x48   : > { %v333_v6 = vsub.f32 %v279_v4, %v331_v5  ;;  %v288_v14 = vadd.s32 %v287_v11, %v286_v10  ;;  %vm297_vm1 = vcmp.lt.f32.partialorder %v296_v13, 0.0 }
  0x4a   : > { %v334_v8 = vsub.f32 0.001, %v333_v6  ;;  %vm289_vm2 = vcmp.lt.s32.totalorder %v288_v14, 700  ;;  %v314_v39 = vld [vmem:[#allocation2] sm:$0x1] }
  0x4b   : > { %306 = vperm.xlu0 %675, %v281_v1   ;;  %v338_v42 = vld [vmem:[#allocation3] sm:$0x1] }
  0x4c   : > { %v335_v12 = vmax.f32 %v334_v8, 0.0 }
  0x4e   : > { %v336_v16 = vmul.f32 %v335_v12, %v335_v12 }
  0x50   : > { %v337_v18 = vsel %vm289_vm2, %v336_v16, 0.0 }
  0x51   : > { %v340_v21 = vrot.slane %v337_v18, 1 }
  0x53   : > { %v343_v24 = vsel %vm342_vm4, %v340_v21, 0.0 }
  0xc2   : > { %v302_v15 = vpop.permute.xlu0 %301 }
  0xc6   : > { %v307_v17 = vpop.permute.xlu0 %306 }
  0xc7   : > { %v309_v19 = vsel %vm297_vm1, %v302_v15, %v307_v17 }
  0xc8   : > { %v310_v20 = vmul.f32 %v309_v19, %v296_v13 }
  0xca   : > { %v313_v22 = vsel %vm289_vm2, %v310_v20, 0.0 }
  0xcb   : > { %v316_v23 = vsel %vm315_vm3, %v313_v22, 0.0 }
  0xcc   : > { %317 = vadd.xlane.f32.xlu1 %v316_v23 }
  0xd0   : > { %344 = vadd.xlane.f32.xlu1 %v343_v24 }
 0x155   : > { %v318_v25 = vpop.xlane.xlu1 %317 }
 0x156   : > { %v319_v26 = vrot.slane %v318_v25, 4 }
 0x158   : > { %v320_v27 = vadd.f32 %v319_v26, %v318_v25 }
 0x159   : > { %v345_v28 = vpop.xlane.xlu1 %344 }
 0x15a   : > { %v321_v29 = vrot.slane %v320_v27, 2  ;;  %v346_v30 = vrot.slane %v345_v28, 4 }
 0x15c   : > { %v347_v31 = vadd.f32 %v346_v30, %v345_v28  ;;  %v322_v32 = vadd.f32 %v321_v29, %v320_v27 }
 0x15e   : > { %v348_v33 = vrot.slane %v347_v31, 2  ;;  %v323_v34 = vrot.slane %v322_v32, 1 }
 0x160   : > { %v349_v35 = vadd.f32 %v348_v33, %v347_v31  ;;  %v324_v36 = vadd.f32 %v323_v34, %v322_v32 }
 0x162   : > { %561 = vpush %v324_v36  ;;  %v350_v37 = vrot.slane %v349_v35, 1 }
 0x164   : > { %v351_v38 = vadd.f32 %v350_v37, %v349_v35 }
 0x166   : > { %563 = vpush %v351_v38 }
 0x193   : > { %s562_s12 = spop %561 }
 0x194   : > { %v326_v40 = vstv %s562_s12 }
 0x195   : > { %v327_v41 = vadd.f32 %v326_v40, %v314_v39 }
 0x197   : > { %329 = vst.msk [vmem:[#allocation2] sm:$0x1] %vm328_vm5, %v327_v41  ;;  %s564_s23 = spop %563  ;;  %359 = sbr.rel (%p552_p3) target bundleno = 544 (0x220), region = 44 }
 0x198   : > { %v353_v43 = vstv %s564_s23 }
 0x199   : > { %v354_v44 = vadd.f32 %v353_v43, %v338_v42 }
 0x19b   : > { %355 = vst.msk [vmem:[#allocation3] sm:$0x1] %vm328_vm5, %v354_v44 }
 0x19c   : > { %v860_v46 = vmov 0  }
 0x19d   : > { %676 = vset.pattern.permute.xlu0 %v860_v46 }
 0x19e   : > { %v553_v45 = vld [vmem:[#allocation2] ss:$0 sm:$0xff] }
 0x19f   : > { %367 = vperm.xlu0 %676, %v553_v45  }
 0x1a2   : > { %v554_v47 = vld [vmem:[#allocation3] ss:$0 sm:$0xff] }
 0x1a3   : > { %378 = vperm.xlu0 %676, %v554_v47  }
 0x21a   : > { %v368_v48 = vpop.permute.xlu0 %367 }
 0x21b   : > { %370 = vst [vmem:[%s1025_s24] sm:$0xff] %v368_v48 }
 0x21e   : > { %v379_v49 = vpop.permute.xlu0 %378 }
 0x21f   : > { %381 = vst [vmem:[%s1027_s7] sm:$0xff] %v379_v49 }
 0x220 PF: > { %s1121_s21 = sshll.u32 %s843_s22, 7  ;;  %s401_s9 = sshll.u32 %s1025_s24, 4  ;;  %s402_s9 = int_to_ptr.vmem [resolvable:$true] %s401_s9 }
 0x221   : > { %s399_s27 = scalar_lea.hbm %s1115_s3, %s1121_s21  ;;  %s383_s29 = scalar_lea.sflag [#allocation6], %s1017_s13 }
 0x222   : > { %s705_s6 = scalar_lea.vmem %s402_s9, 128  ;;  %s861_s8 = smov [#allocation7]  }
 0x223   : > { %p706_p4 = scmp.ne.s32.totalorder %s402_s9, %s705_s6  ;;  %s709_s11 = sshll.u32 %s861_s8, 4  ;;  %s710_s11 = int_to_ptr.vmem [resolvable:$false] %s709_s11 }
 0x224   : > { %s711_s10 = scalar_lea.vmem %s710_s11, 256  ;;  %p712_p9 = scmp.lt.s32.totalorder %s402_s9, %s710_s11 }
 0x225   : > { %p707_p6 = pnand %p706_p4, %p974_p13  ;;  %p713_p10 = scmp.lt.s32.totalorder %s711_s10, %s705_s6 }
 0x227   : > { %p708_p8 = pneg %p707_p6  ;;  %p714_p11 = por %p713_p10, %p712_p9 }
 0x229   : > { %p715_p12 = pnand %p714_p11, %p708_p8 }
 0x22b   : > { %718 = shalt.err (!%p715_p12)
}
 0x22c   : > { %s719_s12 = scalar_lea.hbm %s399_s27, 128  ;;  %s723_s28 = scalar_lea.hbm %s1115_s3, 256 }
 0x22d   : > { %p720_p5 = scmp.ne.s32.totalorder %s399_s27, %s719_s12  ;;  %p724_p2 = scmp.lt.s32.totalorder %s399_s27, %s1115_s3 }
 0x22e   : > { %p725_p7 = scmp.lt.s32.totalorder %s723_s28, %s719_s12 }
 0x22f   : > { %p721_p0 = pnand %p720_p5, %p974_p13 }
 0x230   : > { %p726_p3 = por %p725_p7, %p724_p2 }
 0x231   : > { %p722_p1 = pneg %p721_p0 }
 0x233   : > { %p727_p4 = pnand %p726_p3, %p722_p1 }
 0x235   : > { %730 = shalt.err (!%p727_p4)
}
 0x236   : > { %567 = dma.vmem_to_hbm [thread:$0]  (%p974_p13), %s402_s9, 128, %s399_s27, %s383_s29  }
 0x237   : > { %s1131_s6 = sshll.u32 %s843_s22, 7  ;;  %s414_s24 = sshll.u32 %s1027_s7, 4  ;;  %s415_s24 = int_to_ptr.vmem [resolvable:$true] %s414_s24 }
 0x238   : > { %s412_s10 = scalar_lea.hbm %s1116_s4, %s1131_s6  ;;  %s388_s21 = scalar_lea.sflag [#allocation9], %s1017_s13 }
 0x239   : > { %s731_s23 = scalar_lea.vmem %s415_s24, 128  ;;  %s862_s12 = smov [#allocation8]  }
 0x23a   : > { %p732_p6 = scmp.ne.s32.totalorder %s415_s24, %s731_s23  ;;  %s735_s28 = sshll.u32 %s862_s12, 4  ;;  %s736_s28 = int_to_ptr.vmem [resolvable:$false] %s735_s28 }
 0x23b   : > { %s737_s5 = scalar_lea.vmem %s736_s28, 256  ;;  %p738_p10 = scmp.lt.s32.totalorder %s415_s24, %s736_s28 }
 0x23c   : > { %p733_p8 = pnand %p732_p6, %p974_p13  ;;  %p739_p11 = scmp.lt.s32.totalorder %s737_s5, %s731_s23 }
 0x23e   : > { %p734_p9 = pneg %p733_p8  ;;  %p740_p12 = por %p739_p11, %p738_p10 }
 0x240   : > { %p741_p5 = pnand %p740_p12, %p734_p9 }
 0x242   : > { %744 = shalt.err (!%p741_p5)
}
 0x243   : > { %s745_s22 = scalar_lea.hbm %s412_s10, 128  ;;  %s749_s27 = scalar_lea.hbm %s1116_s4, 256 }
 0x244   : > { %p746_p0 = scmp.ne.s32.totalorder %s412_s10, %s745_s22  ;;  %p750_p7 = scmp.lt.s32.totalorder %s412_s10, %s1116_s4 }
 0x245   : > { %p751_p3 = scmp.lt.s32.totalorder %s749_s27, %s745_s22 }
 0x246   : > { %p747_p1 = pnand %p746_p0, %p974_p13 }
 0x247   : > { %p752_p4 = por %p751_p3, %p750_p7 }
 0x248   : > { %p748_p2 = pneg %p747_p1 }
 0x24a   : > { %p753_p6 = pnand %p752_p4, %p748_p2 }
 0x24c   : > { %756 = shalt.err (!%p753_p6)
}
 0x24d   : > { %568 = dma.vmem_to_hbm [thread:$0]  (%p974_p13), %s415_s24, 128, %s412_s10, %s388_s21  }
 0x24e PF: > { %p583_p8 = scmp.ge.s32.totalorder %s855_s25, 2  ;;  %s426_s6 = sand.u32 1, %s815_s15  }
 0x24f   : > { %p1132_p9 = scmp.ne.s32.totalorder %s1129_s26, 0  ;;  %s427_s8 = scalar_lea.sflag [#allocation6], %s426_s6 }
 0x251   : > { %p576_p10 = pnand %p583_p8, %p1132_p9 }
 0x253   : > { %p577_p11 = pneg %p576_p10 }
 0x255   : > { %806 = dma.done.wait (%p577_p11), %s427_s8, 128  }
 0x256   : > { %808 = vsyncadd (%p577_p11), %s427_s8, 4294967168  ;;  %s436_s11 = scalar_lea.sflag [#allocation9], %s426_s6 }
 0x257   : > { %810 = dma.done.wait (%p577_p11), %s436_s11, 128  }
 0x258   : > { %812 = vsyncadd (%p577_p11), %s436_s11, 4294967168  ;;  %s24_s25 = sadd.s32 1, %s855_s25   ;;  %s1133_s21 = sld [smem:[#allocation13_spill]] }
 0x259   : > { %p21_p12 = scmp.ge.s32.totalorder %s24_s25, 8   ;;  %s1134_s22 = sld [smem:[#allocation14_spill]] }
 0x25a   : > { %s1135_s23 = sld [smem:[#allocation15_spill]]  ;;  %s1137_s15 = smov %s819_s16 }
 0x25b   : > { %s1136_s24 = sld [smem:[#allocation16_spill]]  ;;  %s1138_s16 = smov %s823_s17 }
 0x25c   : > { %s1139_s17 = smov %s979_s18  ;;  %s1140_s18 = smov %s831_s19 }
 0x25d   : > { %s1141_s19 = smov %s835_s20  ;;  %s1142_s20 = smov %s982_s30 }
 0x25e   :  { %23 = sbr.rel (!%p21_p12) target bundleno = 11 (0xb), region = 105 }
 0x263   :  { %441 = vsyncpa [#allocation5], 1 }
 0x264   :  { %443 = vsyncpa [#allocation5 + $0x1], 1 }
 0x265   :  { %444 = vsyncpa [#allocation6], 1 }
 0x266   :  { %446 = vsyncpa [#allocation6 + $0x1], 1 }
 0x267   :  { %447 = vsyncpa [#allocation9], 1 }
 0x268   :  { %449 = vsyncpa [#allocation9 + $0x1], 1 }

</bundles_post_ra>
